<compile_context>
chip_gen: v6e
topology: v6e:2x2x1
jax: 0.10.0
libtpu: 0.0.40
codegen_flags: <defaults>
</compile_context>

<pallas_src>
import functools

import jax
import jax.numpy as jnp
from jax import lax
from jax.experimental import pallas as pl
from jax.experimental.pallas import tpu as pltpu


# Deterministic, in-script activation list (cycled over output features),
# mirroring `activation_functions` passed to VDL.__init__.
ACTIVATION_FNS = (
    jnp.tanh,
    jnp.sin,
    lambda v: jnp.maximum(v, 0.0),  # relu
)


def _round_up(a, b):
    return ((a + b - 1) // b) * b


def _vdl_kernel(x_ref, w_ref, b_ref, o_ref, acc_ref, *, n_acts, tn):
    # Hoist ALL grid-position reads to the kernel top level: primitives left
    # inside a pl.when branch jaxpr cannot be lowered by the interpret/CPU
    # fallback path.  The values are captured by the branch closures below.
    k = pl.program_id(2)
    j = pl.program_id(1)
    k_last = pl.num_programs(2) - 1
    col_base = j * tn  # global column offset of this output tile

    @pl.when(k == 0)
    def _():
        acc_ref[...] = jnp.zeros_like(acc_ref)

    # x tile: (tm, tk); w tile: (tn, tk) in native (out_f, in_f) layout.
    # Contract both on their last dim -> (tm, tn).  No transpose in HBM.
    acc_ref[...] += lax.dot_general(
        x_ref[...], w_ref[...],
        dimension_numbers=(((1,), (1,)), ((), ())),
        preferred_element_type=jnp.float32)

    @pl.when(k == k_last)
    def _():
        y = acc_ref[...] + b_ref[...].astype(jnp.float32)
        # GLOBAL output-column index drives the activation cycle (i % n_acts),
        # so tiling along N / trailing padding never misaligns the selection.
        col = col_base + lax.broadcasted_iota(jnp.int32, y.shape, dimension=1)
        sel = col % n_acts
        out = ACTIVATION_FNS[0](y)
        for i in range(1, n_acts):
            out = jnp.where(sel == i, ACTIVATION_FNS[i](y), out)
        o_ref[...] = out.astype(o_ref.dtype)


def vdl_forward(x, weight, bias, *, tm=256, tn=256, tk=512):
    """x: (B, in_f); weight: (out_f, in_f); bias: (out_f,)."""
    B, in_f = x.shape
    out_f, in_f_w = weight.shape
    assert in_f_w == in_f

    # Clamp tiles for small problems, then pad dims to tile multiples so every
    # block is (8,128)-aligned and the output stores are lane-dense.
    tm = min(tm, _round_up(B, 8))
    tn = min(tn, _round_up(out_f, 128))
    tk = min(tk, _round_up(in_f, 128))
    M, N, K = _round_up(B, tm), _round_up(out_f, tn), _round_up(in_f, tk)

    xp = x if (M == B and K == in_f) else jnp.pad(x, ((0, M - B), (0, K - in_f)))
    wp = weight if (N == out_f and K == in_f) else jnp.pad(
        weight, ((0, N - out_f), (0, K - in_f)))
    bp = bias if N == out_f else jnp.pad(bias, (0, N - out_f))
    bp = bp.reshape(1, N)

    kernel = functools.partial(_vdl_kernel, n_acts=len(ACTIVATION_FNS), tn=tn)

    bytes_el = x.dtype.itemsize
    # double-buffered input/output tiles + f32 accumulator + bias row
    vmem_need = (2 * (tm * tk + tn * tk + tm * tn) * bytes_el
                 + tm * tn * 4 + 2 * N * 4)
    cost = pl.CostEstimate(
        flops=2 * M * N * K,
        transcendentals=2 * M * N,  # tanh + sin over the output tile (finalize)
        bytes_accessed=(M * K + N * K + M * N) * bytes_el + N * 4,
    )

    out = pl.pallas_call(
        kernel,
        out_shape=jax.ShapeDtypeStruct((M, N), x.dtype),
        grid_spec=pltpu.PrefetchScalarGridSpec(
            num_scalar_prefetch=0,
            grid=(M // tm, N // tn, K // tk),
            in_specs=[
                pl.BlockSpec((tm, tk), lambda i, j, k: (i, k)),   # x
                pl.BlockSpec((tn, tk), lambda i, j, k: (j, k)),   # W (out_f,in_f)
                pl.BlockSpec((1, tn), lambda i, j, k: (0, j)),    # bias
            ],
            out_specs=pl.BlockSpec((tm, tn), lambda i, j, k: (i, j)),
            scratch_shapes=[pltpu.VMEM((tm, tn), jnp.float32)],
        ),
        compiler_params=pltpu.CompilerParams(
            dimension_semantics=("parallel", "parallel", "arbitrary"),
            vmem_limit_bytes=int(min(max(2 * vmem_need, 16 << 20), 64 << 20)),
        ),
        cost_estimate=cost,
    )(xp, wp, bp)

    if M != B or N != out_f:
        out = out[:B, :out_f]
    return out


def _xavier_uniform(key, out_features, in_features, dtype=jnp.float32):
    # matches nn.init.xavier_uniform_ (gain=1)
    limit = (6.0 / (in_features + out_features)) ** 0.5
    return jax.random.uniform(
        key, (out_features, in_features), dtype=dtype, minval=-limit, maxval=limit
    )


def _reference_forward(x, weight, bias):
    y = x @ weight.T + bias
    n = len(ACTIVATION_FNS)
    cols = [ACTIVATION_FNS[i % n](y[:, i]) for i in range(y.shape[1])]
    return jnp.stack(cols, axis=-1)


if __name__ == "__main__":
    key = jax.random.PRNGKey(0)
    k_x, k_w = jax.random.split(key)

    batch = 8
    in_features = 32
    out_features = 16

    x = jax.random.normal(k_x, (batch, in_features), dtype=jnp.float32)
    weight = _xavier_uniform(k_w, out_features, in_features)
    bias = jnp.zeros((out_features,), dtype=jnp.float32)

    out = jax.block_until_ready(vdl_forward(x, weight, bias))
    ref = _reference_forward(x, weight, bias)

    assert out.shape == (batch, out_features)
    assert jnp.allclose(out, ref, atol=1e-5, rtol=1e-5), "mismatch vs reference"

    print("KERNEL_OK")
</pallas_src>

<mosaic_0001>
module attributes {stable_mosaic.version = 11 : i64} {
  func.func @_vdl_kernel(%arg0: i32, %arg1: i32, %arg2: i32, %arg3: memref<8x128xf32, #tpu.memory_space<vmem>>, %arg4: memref<128x128xf32, #tpu.memory_space<vmem>>, %arg5: memref<1x128xf32, #tpu.memory_space<vmem>>, %arg6: memref<8x128xf32, #tpu.memory_space<vmem>>, %arg7: memref<8x128xf32, #tpu.memory_space<vmem>>) attributes {dimension_semantics = [#tpu.dimension_semantics<parallel>, #tpu.dimension_semantics<parallel>, #tpu.dimension_semantics<arbitrary>], iteration_bounds = array<i64: 1, 1, 1>, scalar_prefetch = 0 : i64, scratch_operands = 1 : i64, tpu.core_type = #tpu.core_type<tc>, window_params = [{transform_indices = @transform_0, window_bounds = array<i64: 8, 128>}, {transform_indices = @transform_1, window_bounds = array<i64: 128, 128>}, {transform_indices = @transform_2, window_bounds = array<i64: 1, 128>}, {transform_indices = @transform_3, window_bounds = array<i64: 8, 128>}]} {
    %c128_i32 = arith.constant 128 : i32
    %0 = arith.muli %arg1, %c128_i32 : i32
    %c0_i32 = arith.constant 0 : i32
    %1 = arith.cmpi eq, %arg2, %c0_i32 : i32
    %2 = arith.extui %1 : i1 to i32
    %c0_i32_0 = arith.constant 0 : i32
    %3 = arith.cmpi ne, %2, %c0_i32_0 : i32
    scf.if %3 {
      %cst_10 = arith.constant 0.000000e+00 : f32
      %13 = vector.broadcast %cst_10 : f32 to vector<8x128xf32>
      %c0_11 = arith.constant 0 : index
      %c0_12 = arith.constant 0 : index
      %14 = vector.load %arg7[%c0_11, %c0_12] : memref<8x128xf32, #tpu.memory_space<vmem>>, vector<8x128xf32>
      tpu.vector_store %arg7[%c0_11, %c0_12], %13 {strides = array<i32>} : memref<8x128xf32, #tpu.memory_space<vmem>>, vector<8x128xf32>,
    } else {
    }
    %c0 = arith.constant 0 : index
    %c0_1 = arith.constant 0 : index
    %4 = vector.load %arg7[%c0, %c0_1] : memref<8x128xf32, #tpu.memory_space<vmem>>, vector<8x128xf32>
    %c0_2 = arith.constant 0 : index
    %c0_3 = arith.constant 0 : index
    %5 = vector.load %arg3[%c0_2, %c0_3] : memref<8x128xf32, #tpu.memory_space<vmem>>, vector<8x128xf32>
    %c0_4 = arith.constant 0 : index
    %c0_5 = arith.constant 0 : index
    %6 = vector.load %arg4[%c0_4, %c0_5] : memref<128x128xf32, #tpu.memory_space<vmem>>, vector<128x128xf32>
    %cst = arith.constant dense<0.000000e+00> : vector<8x128xf32>
    %7 = tpu.matmul %5, %6, %cst {dimension_numbers = #tpu.dot_dimension_numbers<[1], [1], [0], [0], [0, 0, 1, 0], [], []>} : vector<8x128xf32>, vector<128x128xf32>, vector<8x128xf32> -> vector<8x128xf32>
    %8 = arith.addf %4, %7 : vector<8x128xf32>
    %c0_6 = arith.constant 0 : index
    %c0_7 = arith.constant 0 : index
    %9 = vector.load %arg7[%c0_6, %c0_7] : memref<8x128xf32, #tpu.memory_space<vmem>>, vector<8x128xf32>
    tpu.vector_store %arg7[%c0_6, %c0_7], %8 {strides = array<i32>} : memref<8x128xf32, #tpu.memory_space<vmem>>, vector<8x128xf32>,
    %c0_i32_8 = arith.constant 0 : i32
    %10 = arith.cmpi eq, %arg2, %c0_i32_8 : i32
    %11 = arith.extui %10 : i1 to i32
    %c0_i32_9 = arith.constant 0 : i32
    %12 = arith.cmpi ne, %11, %c0_i32_9 : i32
    scf.if %12 {
      %c0_10 = arith.constant 0 : index
      %c0_11 = arith.constant 0 : index
      %13 = vector.load %arg7[%c0_10, %c0_11] : memref<8x128xf32, #tpu.memory_space<vmem>>, vector<8x128xf32>
      %c0_12 = arith.constant 0 : index
      %c0_13 = arith.constant 0 : index
      %14 = vector.load %arg5[%c0_12, %c0_13] : memref<1x128xf32, #tpu.memory_space<vmem>>, vector<1x128xf32>
      %15 = vector.broadcast %14 : vector<1x128xf32> to vector<8x128xf32>
      %16 = arith.addf %13, %15 : vector<8x128xf32>
      %17 = tpu.iota {dimensions = array<i32: 1>} : vector<8x128xi32>
      %18 = vector.broadcast %0 : i32 to vector<8x128xi32>
      %19 = arith.addi %18, %17 : vector<8x128xi32>
      %c3_i32 = arith.constant 3 : i32
      %c0_i32_14 = arith.constant 0 : i32
      %20 = arith.cmpi eq, %c3_i32, %c0_i32_14 : i32
      %c1_i32 = arith.constant 1 : i32
      %21 = arith.select %20, %c1_i32, %c3_i32 : i32
      %22 = vector.broadcast %21 : i32 to vector<8x128xi32>
      %23 = arith.remsi %19, %22 : vector<8x128xi32>
      %c0_i32_15 = arith.constant 0 : i32
      %24 = vector.broadcast %c0_i32_15 : i32 to vector<8x128xi32>
      %25 = arith.cmpi ne, %23, %24 : vector<8x128xi32>
      %c0_i32_16 = arith.constant 0 : i32
      %26 = vector.broadcast %c0_i32_16 : i32 to vector<8x128xi32>
      %27 = arith.cmpi slt, %23, %26 : vector<8x128xi32>
      %c0_i32_17 = arith.constant 0 : i32
      %28 = arith.cmpi slt, %21, %c0_i32_17 : i32
      %29 = vector.broadcast %28 : i1 to vector<8x128xi1>
      %30 = vector.broadcast %29 : vector<8x128xi1> to vector<8x128xi1>
      %31 = arith.xori %27, %30 : vector<8x128xi1>
      %32 = arith.andi %31, %25 : vector<8x128xi1>
      %33 = vector.broadcast %21 : i32 to vector<8x128xi32>
      %34 = arith.addi %23, %33 : vector<8x128xi32>
      %35 = arith.select %32, %34, %23 : vector<8x128xi1>, vector<8x128xi32>
      %36 = math.tanh %16 : vector<8x128xf32>
      %c1_i32_18 = arith.constant 1 : i32
      %37 = vector.broadcast %c1_i32_18 : i32 to vector<8x128xi32>
      %38 = arith.cmpi eq, %35, %37 : vector<8x128xi32>
      %39 = math.sin %16 : vector<8x128xf32>
      %40 = arith.select %38, %39, %36 : vector<8x128xi1>, vector<8x128xf32>
      %c2_i32 = arith.constant 2 : i32
      %41 = vector.broadcast %c2_i32 : i32 to vector<8x128xi32>
      %42 = arith.cmpi eq, %35, %41 : vector<8x128xi32>
      %cst_19 = arith.constant 0.000000e+00 : f32
      %43 = vector.broadcast %cst_19 : f32 to vector<8x128xf32>
      %44 = arith.maximumf %16, %43 : vector<8x128xf32>
      %45 = arith.select %42, %44, %40 : vector<8x128xi1>, vector<8x128xf32>
      %c0_20 = arith.constant 0 : index
      %c0_21 = arith.constant 0 : index
      %46 = vector.load %arg6[%c0_20, %c0_21] : memref<8x128xf32, #tpu.memory_space<vmem>>, vector<8x128xf32>
      tpu.vector_store %arg6[%c0_20, %c0_21], %45 {strides = array<i32>} : memref<8x128xf32, #tpu.memory_space<vmem>>, vector<8x128xf32>,
    } else {
    }
    return
  }
  func.func @transform_0(%arg0: i32, %arg1: i32, %arg2: i32) -> (i32, i32) {
    %c0_i32 = arith.constant 0 : i32
    return %arg0, %arg2 : i32, i32
  }
  func.func @transform_1(%arg0: i32, %arg1: i32, %arg2: i32) -> (i32, i32) {
    %c0_i32 = arith.constant 0 : i32
    return %arg1, %arg2 : i32, i32
  }
  func.func @transform_2(%arg0: i32, %arg1: i32, %arg2: i32) -> (i32, i32) {
    %c0_i32 = arith.constant 0 : i32
    %c0_i32_0 = arith.constant 0 : i32
    return %c0_i32, %arg1 : i32, i32
  }
  func.func @transform_3(%arg0: i32, %arg1: i32, %arg2: i32) -> (i32, i32) {
    %c0_i32 = arith.constant 0 : i32
    return %arg0, %arg1 : i32, i32
  }
}

</mosaic_0001>

<bundles_post_ra>
// kernel: tpu_custom_call.1
= control target key start
LH: loop header
LB: loop body
LE: loop exit
PB: predicated region body
PF: predicated region fallthrough
CT: control target
= control target key end

     0   :  { %8 = vsyncpa [#allocation4], 0  ;;  %s516_s0 = inlined_call_operand.hbm [shape: f32[8,128], index: 0, kind: input, shape index: {}]   ;;  %s517_s1 = inlined_call_operand.hbm [shape: f32[128,128], index: 1, kind: input, shape index: {}]   ;;  %s518_s2 = inlined_call_operand.vmem [shape: f32[1,128], index: 2, kind: input, shape index: {}]   ;;  %s519_s3 = inlined_call_operand.hbm [shape: f32[8,128], index: 3, kind: output, shape index: {}]  }
   0x1   :  { %9 = vsyncpa [#allocation7], 0 }
   0x2   :  { %10 = vsyncpa [#allocation5], 0  ;;  %s444_s12 = smov [#allocation3]   ;;  %s445_s14 = smov [#allocation6]  }
   0x3   :  { %s17_s13 = sshll.u32 %s444_s12, 4  ;;  %s26_s15 = sshll.u32 %s445_s14, 4  ;;  %s18_s13 = int_to_ptr.vmem [resolvable:$true] %s17_s13  ;;  %s27_s15 = int_to_ptr.vmem [resolvable:$true] %s26_s15 }
   0x4   :  { %s386_s16 = scalar_lea.vmem %s18_s13, 128  ;;  %p391_p1 = scmp.lt.s32.totalorder %s18_s13, %s18_s13 }
   0x5   :  { %p387_p0 = scmp.ne.s32.totalorder %s18_s13, %s386_s16  ;;  %p392_p2 = scmp.lt.s32.totalorder %s386_s16, %s386_s16 }
   0x7   :  { %p393_p3 = por %p392_p2, %p391_p1 }
   0x9   :  { %p394_p4 = pnand %p393_p3, %p387_p0 }
   0xb   :  { %397 = shalt.err (!%p394_p4)
}
   0xc   :  { %20 = dma.hbm_to_vmem [thread:$0]  %s516_s0, 128, %s18_s13, [#allocation4]  }
   0xd   :  { %s406_s19 = scalar_lea.vmem %s27_s15, 2048  ;;  %p411_p6 = scmp.lt.s32.totalorder %s27_s15, %s27_s15 }
   0xe   :  { %p407_p5 = scmp.ne.s32.totalorder %s27_s15, %s406_s19  ;;  %p412_p7 = scmp.lt.s32.totalorder %s406_s19, %s406_s19 }
  0x10   :  { %p413_p8 = por %p412_p7, %p411_p6 }
  0x12   :  { %p414_p9 = pnand %p413_p8, %p407_p5 }
  0x14   :  { %417 = shalt.err (!%p414_p9)
}
  0x15   :  { %s446_s20 = smov 128   ;;  %s447_s21 = smov 8  }
  0x16   :  { %32 = dma.hbm_to_vmem [thread:$0]  %s517_s1, 2048, %s27_s15, [#allocation7], %s446_s20, %s446_s20, %s447_s21  }
  0x17   :  { %438 = dma.done.wait [#allocation4], 128  }
  0x18   :  { %439 = vsyncadd [#allocation4], 4294967168 }
  0x19   :  { %440 = dma.done.wait [#allocation7], 2048  }
  0x1a   :  { %441 = vsyncadd [#allocation7], 4294965248  ;;  %v448_v0 = vmov 0.0   ;;  %vm449_vm0 = vmmov 0   ;;  %v64_v1 = vld [vmem:[#allocation6 + $0x78] sm:$0xff]  ;;  %v63_v2 = vld [vmem:[#allocation6 + $0x70] sm:$0xff] }
  0x1b   :  { %318 = vmatprep.subr.mxu0 %v448_v0  ;;  %350 = vmatprep.mubr.msk.f32.mxu0 %vm449_vm0, %v448_v0  ;;  %v62_v3 = vld [vmem:[#allocation6 + $0x68] sm:$0xff]  ;;  %v61_v4 = vld [vmem:[#allocation6 + $0x60] sm:$0xff]  ;;  %v60_v5 = vld [vmem:[#allocation6 + $0x58] sm:$0xff]  ;;  %v450_v32 = vmov 683565275  }
  0x1c   :  { %319 = vmatpush3.xpose.msra.mxu0 %v64_v1  ;;  %v59_v6 = vld [vmem:[#allocation6 + $0x50] sm:$0xff]  ;;  %v58_v7 = vld [vmem:[#allocation6 + $0x48] sm:$0xff]  ;;  %v57_v8 = vld [vmem:[#allocation6 + $0x40] sm:$0xff]  ;;  %v451_v34 = vmov 2475754826  }
  0x1d   :  { %320 = vmatprep.subr.mxu0 %v448_v0  ;;  %v56_v9 = vld [vmem:[#allocation6 + $0x38] sm:$0xff]  ;;  %v55_v10 = vld [vmem:[#allocation6 + $0x30] sm:$0xff]  ;;  %v54_v11 = vld [vmem:[#allocation6 + $0x28] sm:$0xff]  ;;  %v452_v37 = vmov 2131351028  }
  0x1e   :  { %v53_v12 = vld [vmem:[#allocation6 + $0x20] sm:$0xff]  ;;  %v52_v13 = vld [vmem:[#allocation6 + $0x18] sm:$0xff]  ;;  %v51_v14 = vld [vmem:[#allocation6 + $0x10] sm:$0xff]  ;;  %v453_v40 = vmov 2102212464  }
  0x1f   :  { %v50_v15 = vld [vmem:[#allocation6 + $0x8] sm:$0xff]  ;;  %v49_v16 = vld [vmem:[#allocation6] sm:$0xff]  ;;  %v48_v17 = vld [vmem:[#allocation3] sm:$0xff]  ;;  %v454_v43 = vmov 920167782  }
  0x20   :  { %321 = vmatpush3.xpose.msra.mxu0 %v63_v2  ;;  %v296_v18 = vld [vmem:[%s518_s2] ss:$0 sm:$0xff]  ;;  %v455_v46 = vmov 1326507024   ;;  %s456_s2 = smov [#allocation8]  }
  0x21   :  { %322 = vmatprep.subr.mxu0 %v448_v0  ;;  %s286_s24 = sshll.u32 %s456_s2, 4  ;;  %s287_s24 = int_to_ptr.vmem [resolvable:$true] %s286_s24 }
  0x22   :  { %s418_s25 = scalar_lea.vmem %s287_s24, 128  ;;  %p423_p11 = scmp.lt.s32.totalorder %s287_s24, %s287_s24 }
  0x23   :  { %p419_p10 = scmp.ne.s32.totalorder %s287_s24, %s418_s25  ;;  %p424_p12 = scmp.lt.s32.totalorder %s418_s25, %s418_s25 }
  0x24   :  { %323 = vmatpush3.xpose.msra.mxu0 %v62_v3 }
  0x25   :  { %324 = vmatprep.subr.mxu0 %v448_v0  ;;  %p425_p13 = por %p424_p12, %p423_p11 }
  0x27   :  { %p426_p0 = pnand %p425_p13, %p419_p10 }
  0x28   :  { %325 = vmatpush3.xpose.msra.mxu0 %v61_v4 }
  0x29   :  { %326 = vmatprep.subr.mxu0 %v448_v0 }
  0x2c   :  { %327 = vmatpush3.xpose.msra.mxu0 %v60_v5 }
  0x2d   :  { %328 = vmatprep.subr.mxu0 %v448_v0 }
  0x30   :  { %329 = vmatpush3.xpose.msra.mxu0 %v59_v6 }
  0x31   :  { %330 = vmatprep.subr.mxu0 %v448_v0 }
  0x34   :  { %331 = vmatpush3.xpose.msra.mxu0 %v58_v7 }
  0x35   :  { %332 = vmatprep.subr.mxu0 %v448_v0 }
  0x38   :  { %333 = vmatpush3.xpose.msra.mxu0 %v57_v8 }
  0x39   :  { %334 = vmatprep.subr.mxu0 %v448_v0 }
  0x3c   :  { %335 = vmatpush3.xpose.msra.mxu0 %v56_v9 }
  0x3d   :  { %336 = vmatprep.subr.mxu0 %v448_v0 }
  0x40   :  { %337 = vmatpush3.xpose.msra.mxu0 %v55_v10 }
  0x41   :  { %338 = vmatprep.subr.mxu0 %v448_v0 }
  0x44   :  { %339 = vmatpush3.xpose.msra.mxu0 %v54_v11 }
  0x45   :  { %340 = vmatprep.subr.mxu0 %v448_v0 }
  0x48   :  { %341 = vmatpush3.xpose.msra.mxu0 %v53_v12 }
  0x49   :  { %342 = vmatprep.subr.mxu0 %v448_v0 }
  0x4c   :  { %343 = vmatpush3.xpose.msra.mxu0 %v52_v13 }
  0x4d   :  { %344 = vmatprep.subr.mxu0 %v448_v0 }
  0x50   :  { %345 = vmatpush3.xpose.msra.mxu0 %v51_v14 }
  0x51   :  { %346 = vmatprep.subr.mxu0 %v448_v0 }
  0x54   :  { %347 = vmatpush3.xpose.msra.mxu0 %v50_v15 }
  0x55   :  { %348 = vmatprep.subr.mxu0 %v448_v0 }
  0x58   :  { %349 = vmatpush3.xpose.msra.mxu0 %v49_v16 }
  0x5b   :  { %351 = vmatmul.mubr.f32.vlgmr.msra.gmra.mxu0 %v48_v17 }
 0x11b   :  { %v131_v19 = vpop.f32.mrf.mxu0 }
 0x11c   :  { %v486_v20 = vadd.f32 %v296_v18, %v131_v19  ;;  %v149_v19 = vlaneseq }
 0x11d   :  { %v352_v21 = vpop.f32.mrf.mxu0 }
 0x11e   :  { %v174_v22 = vand.u32 2139095040, %v486_v20  ;;  %v171_v26 = vand.u32 2147483647, %v486_v20  ;;  %vm173_vm8 = vcmp.lt.s32.totalorder %v486_v20, 0 }
 0x120   :  { %v175_v23 = vshrl.u32 %v174_v22, 23  ;;  %v178_v30 = vand.u32 8388607, %v171_v26  ;;  %vm172_vm9 = vcmp.le.f32.partialorder %v171_v26, 0.7853982 }
 0x122   :  { %v297_v24 = vadd.s32 4294967169, %v175_v23  ;;  %v179_v48 = vor.u32 8388608, %v178_v30  ;;  %v150_v23 = vand.u32 127, %v149_v19 }
 0x124   :  { %v181_v25 = vadd.s32 1, %v297_v24  ;;  %v219_v62 = vshll.u32 %v179_v48, 8 }
 0x126   :  { %vm182_vm1 = vcmp.gt.s32.totalorder %v181_v25, 0 }
 0x127   :  { %v183_v27 = vsel %vm182_vm1, %v181_v25, 0  ;;  %vm263_vm1 = vweird.f32 %v486_v20 }
 0x128   :  { %v185_v28 = vand.u32 31, %v183_v27  ;;  %v184_v31 = vshrl.u32 %v183_v27, 5 }
 0x12a   :  { %v186_v29 = vsub.s32 32, %v185_v28  ;;  %v188_v33 = vshll.u32 %v450_v32, %v185_v28  ;;  %v191_v35 = vshll.u32 %v451_v34, %v185_v28  ;;  %v194_v39 = vshll.u32 %v452_v37, %v185_v28 }
 0x12b   :  { %v197_v42 = vshll.u32 %v453_v40, %v185_v28  ;;  %v200_v45 = vshll.u32 %v454_v43, %v185_v28  ;;  %vm203_vm2 = vcmp.lt.s32.totalorder %v184_v31, 1  ;;  %vm206_vm3 = vcmp.lt.s32.totalorder %v184_v31, 4 }
 0x12c   :  { %v189_v36 = vshrl.u32 %v451_v34, %v186_v29  ;;  %v192_v38 = vshrl.u32 %v452_v37, %v186_v29  ;;  %v195_v41 = vshrl.u32 %v453_v40, %v186_v29  ;;  %v198_v44 = vshrl.u32 %v454_v43, %v186_v29 }
 0x12d   :  { %v201_v47 = vshrl.u32 %v455_v46, %v186_v29  ;;  %v187_v57 = vshrl.u32 %v450_v32, %v186_v29  ;;  %vm205_vm4 = vcmp.lt.s32.totalorder %v184_v31, 3  ;;  %vm204_vm5 = vcmp.lt.s32.totalorder %v184_v31, 2 }
 0x12e   :  { %v190_v49 = vor.u32 %v189_v36, %v188_v33  ;;  %v193_v50 = vor.u32 %v192_v38, %v191_v35  ;;  %v196_v51 = vor.u32 %v195_v41, %v194_v39  ;;  %v199_v52 = vor.u32 %v198_v44, %v197_v42 }
 0x12f   :  { %v202_v53 = vor.u32 %v201_v47, %v200_v45  ;;  %v502_v31 = vmul.u32.u64.low 2863311531, %v150_v23  ;;  %v503_v32 = vmul.u32.u64.high 2863311531, %v150_v23, %v502_v31 }
 0x130   :  { %v208_v54 = vsel %vm206_vm3, %v196_v51, 2102212464  ;;  %v211_v55 = vsel %vm203_vm2, %v190_v49, %v193_v50  ;;  %v215_v56 = vsel %vm203_vm2, %v193_v50, %v196_v51  ;;  %v212_v58 = vsel %vm206_vm3, %v199_v52, 920167782 }
 0x131   :  { %v216_v59 = vsel %vm206_vm3, %v202_v53, 1326507024  ;;  %v213_v60 = vsel %vm205_vm4, %v196_v51, %v212_v58  ;;  %v207_v63 = vsel %vm203_vm2, %v187_v57, %v190_v49  ;;  %v209_v0 = vsel %vm205_vm4, %v193_v50, %v208_v54 }
 0x132   :  { %v217_v61 = vsel %vm205_vm4, %v199_v52, %v216_v59  ;;  %v214_v1 = vsel %vm204_vm5, %v211_v55, %v213_v60  ;;  %v210_v7 = vsel %vm204_vm5, %v207_v63, %v209_v0  ;;  %v159_v39 = vshrl.u32 %v503_v32, 1 }
 0x133   :  { %v218_v2 = vsel %vm204_vm5, %v215_v56, %v217_v61  ;;  %v495_v5 = vmul.u32.u64.low %v219_v62, %v214_v1  ;;  %v496_v6 = vmul.u32.u64.high %v219_v62, %v214_v1, %v495_v5  ;;  %v226_v9 = vmul.u32 %v219_v62, %v210_v7 }
 0x134   :  { %v492_v3 = vmul.u32.u64.low %v219_v62, %v218_v2  ;;  %v493_v4 = vmul.u32.u64.high %v219_v62, %v218_v2, %v492_v3  ;;  %v160_v44 = vmul.u32 3, %v159_v39  ;;  %v277_v60 = vmax.f32 %v486_v20, 0.0 }
 0x135   :  { %v229_v8 = vadd.s32 1, %v496_v6 }
 0x136   :  { %vm228_vm6 = vc.u32 %v493_v4, %v495_v5  ;;  %v227_v24 = vadd.s32 %v495_v5, %v493_v4  ;;  %v161_v46 = vsub.s32 %v150_v23, %v160_v44 }
 0x137   :  { %v230_v10 = vsel %vm228_vm6, %v229_v8, %v496_v6 }
 0x138   :  { %v231_v11 = vadd.s32 %v230_v10, %v226_v9  ;;  %vm164_vm10 = vcmp.ne.s32.totalorder %v161_v46, 0  ;;  %vm165_vm11 = vcmp.lt.s32.totalorder %v161_v46, 0  ;;  %v167_v49 = vadd.s32 3, %v161_v46 }
 0x139   :  { %vm166_vm12 = vmand %vm165_vm11, %vm164_vm10 }
 0x13a   :  { %v232_v12 = vadd.s32 536870912, %v231_v11  ;;  %v168_v26 = vsel %vm166_vm12, %v167_v49, %v161_v46 }
 0x13b   :  { %vm170_vm15 = vcmp.eq.s32.totalorder %v168_v26, 1  ;;  %vm276_vm2 = vcmp.eq.s32.totalorder %v168_v26, 2 }
 0x13c   :  { %v233_v13 = vshrl.u32 %v232_v12, 30 }
 0x13e   :  { %v234_v14 = vshll.u32 %v233_v13, 30  ;;  %v257_v41 = vsub.s32 4, %v233_v13 }
 0x140   :  { %v235_v15 = vsub.s32 %v231_v11, %v234_v14  ;;  %v258_v45 = vsel %vm173_vm8, %v257_v41, %v233_v13 }
 0x141   :  { %v260_v47 = vsel %vm172_vm9, 0, %v258_v45 }
 0x142   :  { %v237_v16 = vsub.s32 0, %v235_v15  ;;  %v264_v48 = vadd.s32 3, %v260_v47 }
 0x144   :  { %v298_v17 = vmin.u32 %v237_v16, %v235_v15  ;;  %v265_v50 = vand.u32 3, %v264_v48 }
 0x146   :  { %v239_v18 = vclz %v298_v17  ;;  %vm270_vm13 = vcmp.eq.s32.totalorder %v265_v50, 2  ;;  %vm267_vm14 = vcmp.eq.s32.totalorder %v265_v50, 0  ;;  %vm266_vm0 = vcmp.lt.s32.totalorder %v265_v50, 2 }
 0x148   :  { %v299_v21 = vadd.s32 4294967294, %v239_v18 }
 0x14a   :  { %vm300_vm7 = vcmp.lt.s32.totalorder %v299_v21, 0 }
 0x14b   :  { %v242_v22 = vsel %vm300_vm7, 0, %v299_v21 }
 0x14c   :  { %v243_v25 = vsub.s32 32, %v242_v22  ;;  %v247_v27 = vsub.s32 4294967266, %v242_v22  ;;  %v244_v28 = vshll.u32 %v235_v15, %v242_v22 }
 0x14e   :  { %v245_v29 = vshrl.u32 %v227_v24, %v243_v25  ;;  %v248_v30 = vadd.s32 127, %v247_v27 }
 0x150   :  { %v246_v33 = vor.u32 %v245_v29, %v244_v28  ;;  %v249_v34 = vshll.u32 %v248_v30, 23 }
 0x152   :  { %v250_v35 = vor.u32 4788187, %v249_v34  ;;  %v253_v37 = vcvt.s32.f32 %v246_v33 }
 0x154   :  { %v251_v36 = vand.u32 2147483647, %v250_v35 }
 0x156   :  { %v254_v38 = vmul.f32 %v253_v37, %v251_v36 }
 0x158   :  { %v255_v40 = vxor.u32 2147483648, %v254_v38 }
 0x15a   :  { %v256_v42 = vsel %vm173_vm8, %v255_v40, %v254_v38 }
 0x15b   :  { %v259_v43 = vsel %vm172_vm9, %v486_v20, %v256_v42 }
 0x15c   :  { %372 = vcosq.f32 %v259_v43 }
 0x15d   :  { %374 = vsinq.f32 %v259_v43 }
 0x15e   :  { %376 = vtanh.f32 %v486_v20 }
 0x169   :  { %v373_v51 = vpop.eup %372 }
 0x16a   :  { %v375_v52 = vpop.eup %374  ;;  %v271_v53 = vxor.u32 2147483648, %v373_v51 }
 0x16b   :  { %v268_v54 = vxor.u32 2147483648, %v375_v52  ;;  %v377_v58 = vpop.eup %376 }
 0x16c   :  { %v272_v55 = vsel %vm270_vm13, %v271_v53, %v375_v52 }
 0x16d   :  { %v269_v56 = vsel %vm267_vm14, %v373_v51, %v268_v54 }
 0x16e   :  { %v273_v57 = vsel %vm266_vm0, %v269_v56, %v272_v55 }
 0x16f   :  { %v274_v59 = vsel %vm263_vm1, nan, %v273_v57 }
 0x170   :  { %v275_v61 = vsel %vm170_vm15, %v274_v59, %v377_v58 }
 0x171   :  { %v278_v62 = vsel %vm276_vm2, %v277_v60, %v275_v61 }
 0x172   :  { %279 = vst [vmem:[#allocation8] sm:$0xff] %v278_v62 }
 0x173   :  { %429 = shalt.err (!%p426_p0)
}
 0x174   :  { %289 = dma.vmem_to_hbm [thread:$0]  %s287_s24, 128, %s519_s3, [#allocation5]  }
 0x175   :  { %442 = dma.done.wait [#allocation5], 128  }
 0x176   :  { %443 = vsyncadd [#allocation5], 4294967168 }
 0x177   :  { %293 = vsyncpa [#allocation4], 1 }
 0x178   :  { %294 = vsyncpa [#allocation7], 1 }
 0x179   :  { %295 = vsyncpa [#allocation5], 1 }

</bundles_post_ra>
